<compile_context>
chip_gen: v6e
topology: v6e:2x2x1
jax: 0.10.0
libtpu: 0.0.40
codegen_flags: <defaults>
</compile_context>

<pallas_src>
import jax
import jax.numpy as jnp
from jax import lax
from jax.experimental import pallas as pl
from jax.experimental.pallas import tpu as pltpu

N = 8            # nodes per graph; ninput == N (adjacency doubles as initial features)
NINPUT = N
NHID = 32
DROPOUT = 0.5    # unused at inference
NLAYERS = 7      # gc1 .. gc7
LOG2_N = 3       # N == 8 (power of two; used for shift/mask index math)

# ---- packed-parameter layout: one (PACK_ROWS, NHID) f32 buffer, 8-row aligned segments
_OFF_W0 = 0      # (NINPUT, NHID)                 rows [0, 8)
_OFF_B0 = 8      # (1, NHID)                      row 8
_OFF_WST = 16    # 6 x (NHID, NHID)               rows [16, 208)
_OFF_BST = 208   # 6 x (1, NHID), one per 8-row slot: rows 208, 216, ..., 248
_OFF_MW1 = 256   # (NHID, NHID)                   rows [256, 288)
_OFF_MB1 = 288   # (1, NHID)                      row 288
_OFF_MW2 = 296   # (1, NHID)  Linear(NHID,1) weight transposed
_OFF_MB2 = 304   # (1, NHID)  Linear(NHID,1) bias broadcast over lanes
PACK_ROWS = 312


def _l2_normalize(x, eps=1e-12):
    # == torch.nn.functional.normalize(x, p=2, dim=1): x / max(||x||_2, eps).
    # rsqrt(max(ss, eps^2)) differs from x / max(sqrt(ss), eps) only for
    # 0 < ss < eps^2 and in rsqrt rounding — benign at 1e-4 tolerance.
    ss = jnp.sum(x * x, axis=1, keepdims=True)
    return x * lax.rsqrt(jnp.maximum(ss, eps * eps))


def gnn2_kernel(adj1s_ref, adj2s_ref, params_ref, out_ref, x_ref, acc_ref, bd_ref):
    """One grid step = K groups of G graphs; each group is stacked on the
    node (sublane) axis so every MXU matmul sees gn = G*N rows.

    adj1s_ref : (1, K*gn, N)       per-graph adj1 rows, stacked (group-major)
    adj2s_ref : (1, K*gn, N)       per-graph adj2 rows, stacked (group-major)
    params_ref: (PACK_ROWS, NHID)  packed parameters (same block every step)
    out_ref   : (1, 1, K*gn)       per-node scores, one lane-dense row
    x_ref     : VMEM (K*gn, NHID)  current layer activation
    acc_ref   : VMEM (K*gn, NHID)  running sum of relu(x_l @ mw1 + mb1)
    bd_ref    : VMEM (K, gn, gn)   per-group block-diagonal adj2 (built here)
    """
    kk, gn, _ = bd_ref.shape

    # ---- build the K block-diagonal adj2 tiles once per step (reused 6x).
    #  sel[j, c] = 1 if (c mod N) == j  -> (a2 @ sel)[r, c] = a2[r, c mod N]
    #  same_graph[r, c] = (r // N) == (c // N)   (N is a power of two -> shifts)
    sel = (jnp.bitwise_and(lax.broadcasted_iota(jnp.int32, (N, gn), 1), N - 1)
           == lax.broadcasted_iota(jnp.int32, (N, gn), 0)).astype(jnp.float32)
    r_iota = lax.broadcasted_iota(jnp.int32, (gn, gn), 0)
    c_iota = lax.broadcasted_iota(jnp.int32, (gn, gn), 1)
    same_graph = (jnp.right_shift(r_iota, LOG2_N)
                  == jnp.right_shift(c_iota, LOG2_N))
    for k in range(kk):
        a2k = adj2s_ref[0, k * gn:(k + 1) * gn, :]                      # (gn, N)
        tiled = jnp.dot(a2k, sel, preferred_element_type=jnp.float32)   # (gn, gn)
        bd_ref[k] = jnp.where(same_graph, tiled, 0.0)

    def mlp_hidden(xk):
        # first MLP layer of the scoring head; dropout -> identity (eval)
        mw1 = params_ref[_OFF_MW1:_OFF_MW1 + NHID, :]
        mb1 = params_ref[_OFF_MB1:_OFF_MB1 + 1, :]
        return jnp.maximum(
            jnp.dot(xk, mw1, preferred_element_type=jnp.float32) + mb1, 0.0)

    # ---- gc1 (GNN_Layer_Init): adj1 @ W0 + b0, relu, row L2-normalize
    for k in range(kk):
        sl = slice(k * gn, (k + 1) * gn)
        w0 = params_ref[_OFF_W0:_OFF_W0 + NINPUT, :]
        b0 = params_ref[_OFF_B0:_OFF_B0 + 1, :]
        xk = jnp.dot(adj1s_ref[0, sl, :], w0,
                     preferred_element_type=jnp.float32) + b0
        xk = _l2_normalize(jnp.maximum(xk, 0.0))                        # x2_1
        x_ref[sl, :] = xk
        acc_ref[sl, :] = mlp_hidden(xk)

    # ---- gc2..gc7 (GNN_Layer): adj2 @ (x @ Wi) + bi, relu, (normalize except last)
    for i in range(NLAYERS - 1):
        wi = params_ref[_OFF_WST + i * NHID:_OFF_WST + (i + 1) * NHID, :]
        bi = params_ref[_OFF_BST + 8 * i:_OFF_BST + 8 * i + 1, :]
        for k in range(kk):
            sl = slice(k * gn, (k + 1) * gn)
            hk = jnp.dot(x_ref[sl, :], wi, preferred_element_type=jnp.float32)
            hk = jnp.dot(bd_ref[k], hk, preferred_element_type=jnp.float32) + bi
            hk = jnp.maximum(hk, 0.0)
            xk = _l2_normalize(hk) if i < NLAYERS - 2 else hk           # x2_2..x2_7
            x_ref[sl, :] = xk
            acc_ref[sl, :] = acc_ref[sl, :] + mlp_hidden(xk)

    # ---- fused scoring head: single (1,NHID) x (K*gn,NHID)^T contraction
    # score[n] = sum_h acc[n,h] * mw2[h] + NLAYERS * mb2, emitted lane-dense.
    mw2 = params_ref[_OFF_MW2:_OFF_MW2 + 1, :]                          # (1, NHID)
    mb2 = params_ref[_OFF_MB2:_OFF_MB2 + 1, :][:, 0:1]                  # (1, 1)
    score_row = jnp.einsum("oh,nh->on", mw2, acc_ref[...],
                           preferred_element_type=jnp.float32)          # (1, K*gn)
    out_ref[0] = score_row + float(NLAYERS) * mb2


def pack_params(p):
    buf = jnp.zeros((PACK_ROWS, NHID), jnp.float32)
    buf = buf.at[_OFF_W0:_OFF_W0 + NINPUT].set(p["w0"])
    buf = buf.at[_OFF_B0].set(p["b0"][0])
    buf = buf.at[_OFF_WST:_OFF_WST + (NLAYERS - 1) * NHID].set(
        p["wst"].reshape((NLAYERS - 1) * NHID, NHID))
    for i in range(NLAYERS - 1):
        buf = buf.at[_OFF_BST + 8 * i].set(p["bst"][i, 0])
    buf = buf.at[_OFF_MW1:_OFF_MW1 + NHID].set(p["mw1"])
    buf = buf.at[_OFF_MB1].set(p["mb1"][0])
    buf = buf.at[_OFF_MW2].set(p["mw2"][0])
    buf = buf.at[_OFF_MB2].set(jnp.full((NHID,), p["mb2"][0, 0], jnp.float32))
    return buf


def gnn2_forward_batched(adj1, adj2, params, graphs_per_group=16,
                         groups_per_step=4):
    """adj1, adj2: (B, N, N) float32. Returns (B, N, 1) per-node scores.

    graphs_per_group: G graphs stacked block-diagonally per MXU matmul
      (G=16 -> gn=128 fills the v5e MXU; use 32 on v6e/v7x).
    groups_per_step: K groups processed per grid step to amortize step overhead.
    """
    b = adj1.shape[0]
    g = max(1, graphs_per_group)
    kk = max(1, groups_per_step)
    per_step = g * kk
    nblk = pl.cdiv(b, per_step)
    bpad = nblk * per_step
    if bpad != b:
        z = jnp.zeros((bpad - b, N, N), jnp.float32)
        adj1 = jnp.concatenate([adj1, z], axis=0)
        adj2 = jnp.concatenate([adj2, z], axis=0)
    gn = g * N
    kgn = per_step * N

    # Both adjacencies ship as stacked rows; block-diagonal is built in-kernel.
    adj1s = adj1.reshape(nblk, kgn, N)
    adj2s = adj2.reshape(nblk, kgn, N)
    packed = pack_params(params)

    out = pl.pallas_call(
        gnn2_kernel,
        out_shape=jax.ShapeDtypeStruct((nblk, 1, kgn), jnp.float32),
        grid=(nblk,),
        in_specs=[
            pl.BlockSpec((1, kgn, N), lambda i: (i, 0, 0)),
            pl.BlockSpec((1, kgn, N), lambda i: (i, 0, 0)),
            pl.BlockSpec((PACK_ROWS, NHID), lambda i: (0, 0)),   # single DMA, reused
        ],
        out_specs=pl.BlockSpec((1, 1, kgn), lambda i: (i, 0, 0)),
        scratch_shapes=[
            pltpu.VMEM((kgn, NHID), jnp.float32),    # current layer activation
            pltpu.VMEM((kgn, NHID), jnp.float32),    # running MLP-head accumulator
            pltpu.VMEM((kk, gn, gn), jnp.float32),   # per-group block-diagonal adj2
        ],
        compiler_params=pltpu.CompilerParams(
            dimension_semantics=("parallel",)),
    )(adj1s, adj2s, packed)

    scores = out[:, 0, :].reshape(bpad, N, 1)
    return scores[:b]


def gnn2_forward(adj1, adj2, params):
    """Single-graph forward matching the PyTorch module: (N,N),(N,N) -> (N,1)."""
    return gnn2_forward_batched(adj1[None], adj2[None], params,
                                graphs_per_group=1, groups_per_step=1)[0]


def init_params(key):
    ks = jax.random.split(key, 4)

    def glorot(k, shape):
        fan_in, fan_out = shape[-2], shape[-1]
        lim = (6.0 / (fan_in + fan_out)) ** 0.5
        return jax.random.uniform(k, shape, jnp.float32, -lim, lim)

    return dict(
        w0=glorot(ks[0], (NINPUT, NHID)),
        b0=jnp.full((1, NHID), 0.01, jnp.float32),
        wst=glorot(ks[1], (NLAYERS - 1, NHID, NHID)),
        bst=jnp.full((NLAYERS - 1, 1, NHID), 0.01, jnp.float32),
        mw1=glorot(ks[2], (NHID, NHID)),
        mb1=jnp.full((1, NHID), 0.01, jnp.float32),
        mw2=glorot(ks[3], (1, NHID)),        # Linear(NHID, 1) weight, stored (1, NHID)
        mb2=jnp.full((1, 1), 0.01, jnp.float32),
    )


def gnn2_reference(adj1, adj2, p):
    """Plain-JAX reference of the same forward (sqrt-based normalize)."""
    def norm(x, eps=1e-12):
        n = jnp.sqrt(jnp.sum(x * x, axis=1, keepdims=True))
        return x / jnp.maximum(n, eps)

    def mlp(x):
        h = jnp.maximum(x @ p["mw1"] + p["mb1"], 0.0)
        return jnp.sum(h * p["mw2"], axis=1, keepdims=True) + p["mb2"]

    x = norm(jnp.maximum(adj1 @ p["w0"] + p["b0"], 0.0))
    score = mlp(x)
    for i in range(NLAYERS - 1):
        h = jnp.maximum(adj2 @ (x @ p["wst"][i]) + p["bst"][i], 0.0)
        x = norm(h) if i < NLAYERS - 2 else h
        score = score + mlp(x)
    return score


if __name__ == "__main__":
    key = jax.random.PRNGKey(0)
    k_adj, k_params = jax.random.split(key, 2)

    # deterministic "adjacency-like" inputs: symmetric, non-negative, self-loops
    B = 20  # not a multiple of the group size -> also exercises padding
    ka1, ka2 = jax.random.split(k_adj, 2)
    a1 = jax.random.uniform(ka1, (B, N, N), jnp.float32)
    a2 = jax.random.uniform(ka2, (B, N, N), jnp.float32)
    eye_n = jnp.eye(N, dtype=jnp.float32)
    adj1_b = (a1 + jnp.swapaxes(a1, -1, -2)) * 0.5 + eye_n
    adj2_b = (a2 + jnp.swapaxes(a2, -1, -2)) * 0.5 + eye_n

    params = init_params(k_params)

    # single-graph forward (matches the PyTorch module signature)
    out1 = jax.block_until_ready(gnn2_forward(adj1_b[0], adj2_b[0], params))
    ref1 = gnn2_reference(adj1_b[0], adj2_b[0], params)
    assert out1.shape == (N, 1)
    assert jnp.allclose(out1, ref1, rtol=1e-4, atol=1e-4), (out1, ref1)

    refb = jax.vmap(lambda x, y: gnn2_reference(x, y, params))(adj1_b, adj2_b)

    # gn=128 groups (v5e MXU width), K=2 groups per step -> one grid step
    outb = jax.block_until_ready(
        gnn2_forward_batched(adj1_b, adj2_b, params,
                             graphs_per_group=16, groups_per_step=2))
    assert outb.shape == (B, N, 1)
    assert jnp.allclose(outb, refb, rtol=1e-4, atol=1e-4), (outb, refb)

    # smaller groups, several grid steps (exercises the parallel grid axis + padding)
    outc = jax.block_until_ready(
        gnn2_forward_batched(adj1_b, adj2_b, params,
                             graphs_per_group=4, groups_per_step=2))
    assert outc.shape == (B, N, 1)
    assert jnp.allclose(outc, refb, rtol=1e-4, atol=1e-4), (outc, refb)

    print("KERNEL_OK")
</pallas_src>

<mosaic_0001>
module attributes {stable_mosaic.version = 11 : i64} {
  func.func @gnn2_kernel(%arg0: i32, %arg1: memref<1x8x8xf32, #tpu.memory_space<vmem>>, %arg2: memref<1x8x8xf32, #tpu.memory_space<vmem>>, %arg3: memref<312x32xf32, #tpu.memory_space<vmem>>, %arg4: memref<1x1x8xf32, #tpu.memory_space<vmem>>, %arg5: memref<8x32xf32, #tpu.memory_space<vmem>>, %arg6: memref<8x32xf32, #tpu.memory_space<vmem>>, %arg7: memref<1x8x8xf32, #tpu.memory_space<vmem>>) attributes {dimension_semantics = [#tpu.dimension_semantics<parallel>], iteration_bounds = array<i64: 1>, scalar_prefetch = 0 : i64, scratch_operands = 3 : i64, tpu.core_type = #tpu.core_type<tc>, window_params = [{transform_indices = @transform_0, window_bounds = array<i64: 1, 8, 8>}, {transform_indices = @transform_1, window_bounds = array<i64: 1, 8, 8>}, {pipeline_mode = #tpu.pipeline_mode<synchronous>, transform_indices = @transform_2, window_bounds = array<i64: 312, 32>}, {transform_indices = @transform_3, window_bounds = array<i64: 1, 1, 8>}]} {
    %0 = tpu.iota {dimensions = array<i32: 1>} : vector<8x8xi32>
    %c7_i32 = arith.constant 7 : i32
    %1 = vector.broadcast %c7_i32 : i32 to vector<8x8xi32>
    %2 = arith.andi %0, %1 : vector<8x8xi32>
    %3 = tpu.iota {dimensions = array<i32: 0>} : vector<8x8xi32>
    %4 = arith.cmpi eq, %2, %3 : vector<8x8xi32>
    %5 = arith.extui %4 : vector<8x8xi1> to vector<8x8xi32>
    %6 = arith.sitofp %5 : vector<8x8xi32> to vector<8x8xf32>
    %7 = tpu.iota {dimensions = array<i32: 0>} : vector<8x8xi32>
    %8 = tpu.iota {dimensions = array<i32: 1>} : vector<8x8xi32>
    %c3_i32 = arith.constant 3 : i32
    %9 = vector.broadcast %c3_i32 : i32 to vector<8x8xi32>
    %10 = arith.shrsi %7, %9 : vector<8x8xi32>
    %c3_i32_0 = arith.constant 3 : i32
    %11 = vector.broadcast %c3_i32_0 : i32 to vector<8x8xi32>
    %12 = arith.shrsi %8, %11 : vector<8x8xi32>
    %13 = arith.cmpi eq, %10, %12 : vector<8x8xi32>
    %c0 = arith.constant 0 : index
    %c0_1 = arith.constant 0 : index
    %c0_2 = arith.constant 0 : index
    %14 = vector.load %arg2[%c0, %c0_1, %c0_2] : memref<1x8x8xf32, #tpu.memory_space<vmem>>, vector<1x8x8xf32>
    %15 = vector.shape_cast %14 : vector<1x8x8xf32> to vector<8x8xf32>
    %cst = arith.constant dense<0.000000e+00> : vector<8x8xf32>
    %16 = tpu.matmul %15, %6, %cst {dimension_numbers = #tpu.dot_dimension_numbers<[1], [0], [0], [1], [0, 0, 1, 1], [], []>} : vector<8x8xf32>, vector<8x8xf32>, vector<8x8xf32> -> vector<8x8xf32>
    %cst_3 = arith.constant 0.000000e+00 : f32
    %17 = vector.broadcast %cst_3 : f32 to vector<8x8xf32>
    %18 = arith.select %13, %16, %17 : vector<8x8xi1>, vector<8x8xf32>
    %c0_4 = arith.constant 0 : index
    %c0_5 = arith.constant 0 : index
    %c0_6 = arith.constant 0 : index
    %19 = vector.load %arg7[%c0_4, %c0_5, %c0_6] : memref<1x8x8xf32, #tpu.memory_space<vmem>>, vector<1x8x8xf32>
    %20 = vector.shape_cast %19 : vector<1x8x8xf32> to vector<8x8xf32>
    %21 = vector.shape_cast %18 : vector<8x8xf32> to vector<1x8x8xf32>
    tpu.vector_store %arg7[%c0_4, %c0_5, %c0_6], %21 {strides = array<i32>} : memref<1x8x8xf32, #tpu.memory_space<vmem>>, vector<1x8x8xf32>,
    %c0_7 = arith.constant 0 : index
    %c0_8 = arith.constant 0 : index
    %22 = vector.load %arg3[%c0_7, %c0_8] : memref<312x32xf32, #tpu.memory_space<vmem>>, vector<8x32xf32>
    %c8 = arith.constant 8 : index
    %c0_9 = arith.constant 0 : index
    %23 = vector.load %arg3[%c8, %c0_9] : memref<312x32xf32, #tpu.memory_space<vmem>>, vector<1x32xf32>
    %c0_10 = arith.constant 0 : index
    %c0_11 = arith.constant 0 : index
    %c0_12 = arith.constant 0 : index
    %24 = vector.load %arg1[%c0_10, %c0_11, %c0_12] : memref<1x8x8xf32, #tpu.memory_space<vmem>>, vector<1x8x8xf32>
    %25 = vector.shape_cast %24 : vector<1x8x8xf32> to vector<8x8xf32>
    %cst_13 = arith.constant dense<0.000000e+00> : vector<8x32xf32>
    %26 = tpu.matmul %25, %22, %cst_13 {dimension_numbers = #tpu.dot_dimension_numbers<[1], [0], [0], [1], [0, 0, 1, 1], [], []>} : vector<8x8xf32>, vector<8x32xf32>, vector<8x32xf32> -> vector<8x32xf32>
    %27 = vector.broadcast %23 : vector<1x32xf32> to vector<8x32xf32>
    %28 = arith.addf %26, %27 : vector<8x32xf32>
    %cst_14 = arith.constant 0.000000e+00 : f32
    %29 = vector.broadcast %cst_14 : f32 to vector<8x32xf32>
    %30 = arith.maximumf %28, %29 : vector<8x32xf32>
    %31 = arith.mulf %30, %30 : vector<8x32xf32>
    %cst_15 = arith.constant dense<0.000000e+00> : vector<8xf32>
    %32 = vector.multi_reduction <add>, %31, %cst_15 [1] : vector<8x32xf32> to vector<8xf32>
    %33 = vector.shape_cast %32 : vector<8xf32> to vector<8x1xf32>
    %cst_16 = arith.constant 1.000000e-24 : f32
    %34 = vector.broadcast %cst_16 : f32 to vector<8x1xf32>
    %35 = arith.maximumf %33, %34 : vector<8x1xf32>
    %36 = math.rsqrt %35 : vector<8x1xf32>
    %37 = vector.broadcast %36 : vector<8x1xf32> to vector<8x32xf32>
    %38 = arith.mulf %30, %37 : vector<8x32xf32>
    %c0_17 = arith.constant 0 : index
    %c0_18 = arith.constant 0 : index
    %39 = vector.load %arg5[%c0_17, %c0_18] : memref<8x32xf32, #tpu.memory_space<vmem>>, vector<8x32xf32>
    tpu.vector_store %arg5[%c0_17, %c0_18], %38 {strides = array<i32>} : memref<8x32xf32, #tpu.memory_space<vmem>>, vector<8x32xf32>,
    %c256 = arith.constant 256 : index
    %c0_19 = arith.constant 0 : index
    %40 = vector.load %arg3[%c256, %c0_19] : memref<312x32xf32, #tpu.memory_space<vmem>>, vector<32x32xf32>
    %c288 = arith.constant 288 : index
    %c0_20 = arith.constant 0 : index
    %41 = vector.load %arg3[%c288, %c0_20] : memref<312x32xf32, #tpu.memory_space<vmem>>, vector<1x32xf32>
    %cst_21 = arith.constant dense<0.000000e+00> : vector<8x32xf32>
    %42 = tpu.matmul %38, %40, %cst_21 {dimension_numbers = #tpu.dot_dimension_numbers<[1], [0], [0], [1], [0, 0, 1, 1], [], []>} : vector<8x32xf32>, vector<32x32xf32>, vector<8x32xf32> -> vector<8x32xf32>
    %43 = vector.broadcast %41 : vector<1x32xf32> to vector<8x32xf32>
    %44 = arith.addf %42, %43 : vector<8x32xf32>
    %cst_22 = arith.constant 0.000000e+00 : f32
    %45 = vector.broadcast %cst_22 : f32 to vector<8x32xf32>
    %46 = arith.maximumf %44, %45 : vector<8x32xf32>
    %c0_23 = arith.constant 0 : index
    %c0_24 = arith.constant 0 : index
    %47 = vector.load %arg6[%c0_23, %c0_24] : memref<8x32xf32, #tpu.memory_space<vmem>>, vector<8x32xf32>
    tpu.vector_store %arg6[%c0_23, %c0_24], %46 {strides = array<i32>} : memref<8x32xf32, #tpu.memory_space<vmem>>, vector<8x32xf32>,
    %c16 = arith.constant 16 : index
    %c0_25 = arith.constant 0 : index
    %48 = vector.load %arg3[%c16, %c0_25] : memref<312x32xf32, #tpu.memory_space<vmem>>, vector<32x32xf32>
    %c208 = arith.constant 208 : index
    %c0_26 = arith.constant 0 : index
    %49 = vector.load %arg3[%c208, %c0_26] : memref<312x32xf32, #tpu.memory_space<vmem>>, vector<1x32xf32>
    %c0_27 = arith.constant 0 : index
    %c0_28 = arith.constant 0 : index
    %50 = vector.load %arg5[%c0_27, %c0_28] : memref<8x32xf32, #tpu.memory_space<vmem>>, vector<8x32xf32>
    %cst_29 = arith.constant dense<0.000000e+00> : vector<8x32xf32>
    %51 = tpu.matmul %50, %48, %cst_29 {dimension_numbers = #tpu.dot_dimension_numbers<[1], [0], [0], [1], [0, 0, 1, 1], [], []>} : vector<8x32xf32>, vector<32x32xf32>, vector<8x32xf32> -> vector<8x32xf32>
    %c0_30 = arith.constant 0 : index
    %c0_31 = arith.constant 0 : index
    %c0_32 = arith.constant 0 : index
    %52 = vector.load %arg7[%c0_30, %c0_31, %c0_32] : memref<1x8x8xf32, #tpu.memory_space<vmem>>, vector<1x8x8xf32>
    %53 = vector.shape_cast %52 : vector<1x8x8xf32> to vector<8x8xf32>
    %cst_33 = arith.constant dense<0.000000e+00> : vector<8x32xf32>
    %54 = tpu.matmul %53, %51, %cst_33 {dimension_numbers = #tpu.dot_dimension_numbers<[1], [0], [0], [1], [0, 0, 1, 1], [], []>} : vector<8x8xf32>, vector<8x32xf32>, vector<8x32xf32> -> vector<8x32xf32>
    %55 = vector.broadcast %49 : vector<1x32xf32> to vector<8x32xf32>
    %56 = arith.addf %54, %55 : vector<8x32xf32>
    %cst_34 = arith.constant 0.000000e+00 : f32
    %57 = vector.broadcast %cst_34 : f32 to vector<8x32xf32>
    %58 = arith.maximumf %56, %57 : vector<8x32xf32>
    %59 = arith.mulf %58, %58 : vector<8x32xf32>
    %cst_35 = arith.constant dense<0.000000e+00> : vector<8xf32>
    %60 = vector.multi_reduction <add>, %59, %cst_35 [1] : vector<8x32xf32> to vector<8xf32>
    %61 = vector.shape_cast %60 : vector<8xf32> to vector<8x1xf32>
    %cst_36 = arith.constant 1.000000e-24 : f32
    %62 = vector.broadcast %cst_36 : f32 to vector<8x1xf32>
    %63 = arith.maximumf %61, %62 : vector<8x1xf32>
    %64 = math.rsqrt %63 : vector<8x1xf32>
    %65 = vector.broadcast %64 : vector<8x1xf32> to vector<8x32xf32>
    %66 = arith.mulf %58, %65 : vector<8x32xf32>
    %c0_37 = arith.constant 0 : index
    %c0_38 = arith.constant 0 : index
    %67 = vector.load %arg5[%c0_37, %c0_38] : memref<8x32xf32, #tpu.memory_space<vmem>>, vector<8x32xf32>
    tpu.vector_store %arg5[%c0_37, %c0_38], %66 {strides = array<i32>} : memref<8x32xf32, #tpu.memory_space<vmem>>, vector<8x32xf32>,
    %c0_39 = arith.constant 0 : index
    %c0_40 = arith.constant 0 : index
    %68 = vector.load %arg6[%c0_39, %c0_40] : memref<8x32xf32, #tpu.memory_space<vmem>>, vector<8x32xf32>
    %c256_41 = arith.constant 256 : index
    %c0_42 = arith.constant 0 : index
    %69 = vector.load %arg3[%c256_41, %c0_42] : memref<312x32xf32, #tpu.memory_space<vmem>>, vector<32x32xf32>
    %c288_43 = arith.constant 288 : index
    %c0_44 = arith.constant 0 : index
    %70 = vector.load %arg3[%c288_43, %c0_44] : memref<312x32xf32, #tpu.memory_space<vmem>>, vector<1x32xf32>
    %cst_45 = arith.constant dense<0.000000e+00> : vector<8x32xf32>
    %71 = tpu.matmul %66, %69, %cst_45 {dimension_numbers = #tpu.dot_dimension_numbers<[1], [0], [0], [1], [0, 0, 1, 1], [], []>} : vector<8x32xf32>, vector<32x32xf32>, vector<8x32xf32> -> vector<8x32xf32>
    %72 = vector.broadcast %70 : vector<1x32xf32> to vector<8x32xf32>
    %73 = arith.addf %71, %72 : vector<8x32xf32>
    %cst_46 = arith.constant 0.000000e+00 : f32
    %74 = vector.broadcast %cst_46 : f32 to vector<8x32xf32>
    %75 = arith.maximumf %73, %74 : vector<8x32xf32>
    %76 = arith.addf %68, %75 : vector<8x32xf32>
    %c0_47 = arith.constant 0 : index
    %c0_48 = arith.constant 0 : index
    %77 = vector.load %arg6[%c0_47, %c0_48] : memref<8x32xf32, #tpu.memory_space<vmem>>, vector<8x32xf32>
    tpu.vector_store %arg6[%c0_47, %c0_48], %76 {strides = array<i32>} : memref<8x32xf32, #tpu.memory_space<vmem>>, vector<8x32xf32>,
    %c48 = arith.constant 48 : index
    %c0_49 = arith.constant 0 : index
    %78 = vector.load %arg3[%c48, %c0_49] : memref<312x32xf32, #tpu.memory_space<vmem>>, vector<32x32xf32>
    %c216 = arith.constant 216 : index
    %c0_50 = arith.constant 0 : index
    %79 = vector.load %arg3[%c216, %c0_50] : memref<312x32xf32, #tpu.memory_space<vmem>>, vector<1x32xf32>
    %c0_51 = arith.constant 0 : index
    %c0_52 = arith.constant 0 : index
    %80 = vector.load %arg5[%c0_51, %c0_52] : memref<8x32xf32, #tpu.memory_space<vmem>>, vector<8x32xf32>
    %cst_53 = arith.constant dense<0.000000e+00> : vector<8x32xf32>
    %81 = tpu.matmul %80, %78, %cst_53 {dimension_numbers = #tpu.dot_dimension_numbers<[1], [0], [0], [1], [0, 0, 1, 1], [], []>} : vector<8x32xf32>, vector<32x32xf32>, vector<8x32xf32> -> vector<8x32xf32>
    %c0_54 = arith.constant 0 : index
    %c0_55 = arith.constant 0 : index
    %c0_56 = arith.constant 0 : index
    %82 = vector.load %arg7[%c0_54, %c0_55, %c0_56] : memref<1x8x8xf32, #tpu.memory_space<vmem>>, vector<1x8x8xf32>
    %83 = vector.shape_cast %82 : vector<1x8x8xf32> to vector<8x8xf32>
    %cst_57 = arith.constant dense<0.000000e+00> : vector<8x32xf32>
    %84 = tpu.matmul %83, %81, %cst_57 {dimension_numbers = #tpu.dot_dimension_numbers<[1], [0], [0], [1], [0, 0, 1, 1], [], []>} : vector<8x8xf32>, vector<8x32xf32>, vector<8x32xf32> -> vector<8x32xf32>
    %85 = vector.broadcast %79 : vector<1x32xf32> to vector<8x32xf32>
    %86 = arith.addf %84, %85 : vector<8x32xf32>
    %cst_58 = arith.constant 0.000000e+00 : f32
    %87 = vector.broadcast %cst_58 : f32 to vector<8x32xf32>
    %88 = arith.maximumf %86, %87 : vector<8x32xf32>
    %89 = arith.mulf %88, %88 : vector<8x32xf32>
    %cst_59 = arith.constant dense<0.000000e+00> : vector<8xf32>
    %90 = vector.multi_reduction <add>, %89, %cst_59 [1] : vector<8x32xf32> to vector<8xf32>
    %91 = vector.shape_cast %90 : vector<8xf32> to vector<8x1xf32>
    %cst_60 = arith.constant 1.000000e-24 : f32
    %92 = vector.broadcast %cst_60 : f32 to vector<8x1xf32>
    %93 = arith.maximumf %91, %92 : vector<8x1xf32>
    %94 = math.rsqrt %93 : vector<8x1xf32>
    %95 = vector.broadcast %94 : vector<8x1xf32> to vector<8x32xf32>
    %96 = arith.mulf %88, %95 : vector<8x32xf32>
    %c0_61 = arith.constant 0 : index
    %c0_62 = arith.constant 0 : index
    %97 = vector.load %arg5[%c0_61, %c0_62] : memref<8x32xf32, #tpu.memory_space<vmem>>, vector<8x32xf32>
    tpu.vector_store %arg5[%c0_61, %c0_62], %96 {strides = array<i32>} : memref<8x32xf32, #tpu.memory_space<vmem>>, vector<8x32xf32>,
    %c0_63 = arith.constant 0 : index
    %c0_64 = arith.constant 0 : index
    %98 = vector.load %arg6[%c0_63, %c0_64] : memref<8x32xf32, #tpu.memory_space<vmem>>, vector<8x32xf32>
    %c256_65 = arith.constant 256 : index
    %c0_66 = arith.constant 0 : index
    %99 = vector.load %arg3[%c256_65, %c0_66] : memref<312x32xf32, #tpu.memory_space<vmem>>, vector<32x32xf32>
    %c288_67 = arith.constant 288 : index
    %c0_68 = arith.constant 0 : index
    %100 = vector.load %arg3[%c288_67, %c0_68] : memref<312x32xf32, #tpu.memory_space<vmem>>, vector<1x32xf32>
    %cst_69 = arith.constant dense<0.000000e+00> : vector<8x32xf32>
    %101 = tpu.matmul %96, %99, %cst_69 {dimension_numbers = #tpu.dot_dimension_numbers<[1], [0], [0], [1], [0, 0, 1, 1], [], []>} : vector<8x32xf32>, vector<32x32xf32>, vector<8x32xf32> -> vector<8x32xf32>
    %102 = vector.broadcast %100 : vector<1x32xf32> to vector<8x32xf32>
    %103 = arith.addf %101, %102 : vector<8x32xf32>
    %cst_70 = arith.constant 0.000000e+00 : f32
    %104 = vector.broadcast %cst_70 : f32 to vector<8x32xf32>
    %105 = arith.maximumf %103, %104 : vector<8x32xf32>
    %106 = arith.addf %98, %105 : vector<8x32xf32>
    %c0_71 = arith.constant 0 : index
    %c0_72 = arith.constant 0 : index
    %107 = vector.load %arg6[%c0_71, %c0_72] : memref<8x32xf32, #tpu.memory_space<vmem>>, vector<8x32xf32>
    tpu.vector_store %arg6[%c0_71, %c0_72], %106 {strides = array<i32>} : memref<8x32xf32, #tpu.memory_space<vmem>>, vector<8x32xf32>,
    %c80 = arith.constant 80 : index
    %c0_73 = arith.constant 0 : index
    %108 = vector.load %arg3[%c80, %c0_73] : memref<312x32xf32, #tpu.memory_space<vmem>>, vector<32x32xf32>
    %c224 = arith.constant 224 : index
    %c0_74 = arith.constant 0 : index
    %109 = vector.load %arg3[%c224, %c0_74] : memref<312x32xf32, #tpu.memory_space<vmem>>, vector<1x32xf32>
    %c0_75 = arith.constant 0 : index
    %c0_76 = arith.constant 0 : index
    %110 = vector.load %arg5[%c0_75, %c0_76] : memref<8x32xf32, #tpu.memory_space<vmem>>, vector<8x32xf32>
    %cst_77 = arith.constant dense<0.000000e+00> : vector<8x32xf32>
    %111 = tpu.matmul %110, %108, %cst_77 {dimension_numbers = #tpu.dot_dimension_numbers<[1], [0], [0], [1], [0, 0, 1, 1], [], []>} : vector<8x32xf32>, vector<32x32xf32>, vector<8x32xf32> -> vector<8x32xf32>
    %c0_78 = arith.constant 0 : index
    %c0_79 = arith.constant 0 : index
    %c0_80 = arith.constant 0 : index
    %112 = vector.load %arg7[%c0_78, %c0_79, %c0_80] : memref<1x8x8xf32, #tpu.memory_space<vmem>>, vector<1x8x8xf32>
    %113 = vector.shape_cast %112 : vector<1x8x8xf32> to vector<8x8xf32>
    %cst_81 = arith.constant dense<0.000000e+00> : vector<8x32xf32>
    %114 = tpu.matmul %113, %111, %cst_81 {dimension_numbers = #tpu.dot_dimension_numbers<[1], [0], [0], [1], [0, 0, 1, 1], [], []>} : vector<8x8xf32>, vector<8x32xf32>, vector<8x32xf32> -> vector<8x32xf32>
    %115 = vector.broadcast %109 : vector<1x32xf32> to vector<8x32xf32>
    %116 = arith.addf %114, %115 : vector<8x32xf32>
    %cst_82 = arith.constant 0.000000e+00 : f32
    %117 = vector.broadcast %cst_82 : f32 to vector<8x32xf32>
    %118 = arith.maximumf %116, %117 : vector<8x32xf32>
    %119 = arith.mulf %118, %118 : vector<8x32xf32>
    %cst_83 = arith.constant dense<0.000000e+00> : vector<8xf32>
    %120 = vector.multi_reduction <add>, %119, %cst_83 [1] : vector<8x32xf32> to vector<8xf32>
    %121 = vector.shape_cast %120 : vector<8xf32> to vector<8x1xf32>
    %cst_84 = arith.constant 1.000000e-24 : f32
    %122 = vector.broadcast %cst_84 : f32 to vector<8x1xf32>
    %123 = arith.maximumf %121, %122 : vector<8x1xf32>
    %124 = math.rsqrt %123 : vector<8x1xf32>
    %125 = vector.broadcast %124 : vector<8x1xf32> to vector<8x32xf32>
    %126 = arith.mulf %118, %125 : vector<8x32xf32>
    %c0_85 = arith.constant 0 : index
    %c0_86 = arith.constant 0 : index
    %127 = vector.load %arg5[%c0_85, %c0_86] : memref<8x32xf32, #tpu.memory_space<vmem>>, vector<8x32xf32>
    tpu.vector_store %arg5[%c0_85, %c0_86], %126 {strides = array<i32>} : memref<8x32xf32, #tpu.memory_space<vmem>>, vector<8x32xf32>,
    %c0_87 = arith.constant 0 : index
    %c0_88 = arith.constant 0 : index
    %128 = vector.load %arg6[%c0_87, %c0_88] : memref<8x32xf32, #tpu.memory_space<vmem>>, vector<8x32xf32>
    %c256_89 = arith.constant 256 : index
    %c0_90 = arith.constant 0 : index
    %129 = vector.load %arg3[%c256_89, %c0_90] : memref<312x32xf32, #tpu.memory_space<vmem>>, vector<32x32xf32>
    %c288_91 = arith.constant 288 : index
    %c0_92 = arith.constant 0 : index
    %130 = vector.load %arg3[%c288_91, %c0_92] : memref<312x32xf32, #tpu.memory_space<vmem>>, vector<1x32xf32>
    %cst_93 = arith.constant dense<0.000000e+00> : vector<8x32xf32>
    %131 = tpu.matmul %126, %129, %cst_93 {dimension_numbers = #tpu.dot_dimension_numbers<[1], [0], [0], [1], [0, 0, 1, 1], [], []>} : vector<8x32xf32>, vector<32x32xf32>, vector<8x32xf32> -> vector<8x32xf32>
    %132 = vector.broadcast %130 : vector<1x32xf32> to vector<8x32xf32>
    %133 = arith.addf %131, %132 : vector<8x32xf32>
    %cst_94 = arith.constant 0.000000e+00 : f32
    %134 = vector.broadcast %cst_94 : f32 to vector<8x32xf32>
    %135 = arith.maximumf %133, %134 : vector<8x32xf32>
    %136 = arith.addf %128, %135 : vector<8x32xf32>
    %c0_95 = arith.constant 0 : index
    %c0_96 = arith.constant 0 : index
    %137 = vector.load %arg6[%c0_95, %c0_96] : memref<8x32xf32, #tpu.memory_space<vmem>>, vector<8x32xf32>
    tpu.vector_store %arg6[%c0_95, %c0_96], %136 {strides = array<i32>} : memref<8x32xf32, #tpu.memory_space<vmem>>, vector<8x32xf32>,
    %c112 = arith.constant 112 : index
    %c0_97 = arith.constant 0 : index
    %138 = vector.load %arg3[%c112, %c0_97] : memref<312x32xf32, #tpu.memory_space<vmem>>, vector<32x32xf32>
    %c232 = arith.constant 232 : index
    %c0_98 = arith.constant 0 : index
    %139 = vector.load %arg3[%c232, %c0_98] : memref<312x32xf32, #tpu.memory_space<vmem>>, vector<1x32xf32>
    %c0_99 = arith.constant 0 : index
    %c0_100 = arith.constant 0 : index
    %140 = vector.load %arg5[%c0_99, %c0_100] : memref<8x32xf32, #tpu.memory_space<vmem>>, vector<8x32xf32>
    %cst_101 = arith.constant dense<0.000000e+00> : vector<8x32xf32>
    %141 = tpu.matmul %140, %138, %cst_101 {dimension_numbers = #tpu.dot_dimension_numbers<[1], [0], [0], [1], [0, 0, 1, 1], [], []>} : vector<8x32xf32>, vector<32x32xf32>, vector<8x32xf32> -> vector<8x32xf32>
    %c0_102 = arith.constant 0 : index
    %c0_103 = arith.constant 0 : index
    %c0_104 = arith.constant 0 : index
    %142 = vector.load %arg7[%c0_102, %c0_103, %c0_104] : memref<1x8x8xf32, #tpu.memory_space<vmem>>, vector<1x8x8xf32>
    %143 = vector.shape_cast %142 : vector<1x8x8xf32> to vector<8x8xf32>
    %cst_105 = arith.constant dense<0.000000e+00> : vector<8x32xf32>
    %144 = tpu.matmul %143, %141, %cst_105 {dimension_numbers = #tpu.dot_dimension_numbers<[1], [0], [0], [1], [0, 0, 1, 1], [], []>} : vector<8x8xf32>, vector<8x32xf32>, vector<8x32xf32> -> vector<8x32xf32>
    %145 = vector.broadcast %139 : vector<1x32xf32> to vector<8x32xf32>
    %146 = arith.addf %144, %145 : vector<8x32xf32>
    %cst_106 = arith.constant 0.000000e+00 : f32
    %147 = vector.broadcast %cst_106 : f32 to vector<8x32xf32>
    %148 = arith.maximumf %146, %147 : vector<8x32xf32>
    %149 = arith.mulf %148, %148 : vector<8x32xf32>
    %cst_107 = arith.constant dense<0.000000e+00> : vector<8xf32>
    %150 = vector.multi_reduction <add>, %149, %cst_107 [1] : vector<8x32xf32> to vector<8xf32>
    %151 = vector.shape_cast %150 : vector<8xf32> to vector<8x1xf32>
    %cst_108 = arith.constant 1.000000e-24 : f32
    %152 = vector.broadcast %cst_108 : f32 to vector<8x1xf32>
    %153 = arith.maximumf %151, %152 : vector<8x1xf32>
    %154 = math.rsqrt %153 : vector<8x1xf32>
    %155 = vector.broadcast %154 : vector<8x1xf32> to vector<8x32xf32>
    %156 = arith.mulf %148, %155 : vector<8x32xf32>
    %c0_109 = arith.constant 0 : index
    %c0_110 = arith.constant 0 : index
    %157 = vector.load %arg5[%c0_109, %c0_110] : memref<8x32xf32, #tpu.memory_space<vmem>>, vector<8x32xf32>
    tpu.vector_store %arg5[%c0_109, %c0_110], %156 {strides = array<i32>} : memref<8x32xf32, #tpu.memory_space<vmem>>, vector<8x32xf32>,
    %c0_111 = arith.constant 0 : index
    %c0_112 = arith.constant 0 : index
    %158 = vector.load %arg6[%c0_111, %c0_112] : memref<8x32xf32, #tpu.memory_space<vmem>>, vector<8x32xf32>
    %c256_113 = arith.constant 256 : index
    %c0_114 = arith.constant 0 : index
    %159 = vector.load %arg3[%c256_113, %c0_114] : memref<312x32xf32, #tpu.memory_space<vmem>>, vector<32x32xf32>
    %c288_115 = arith.constant 288 : index
    %c0_116 = arith.constant 0 : index
    %160 = vector.load %arg3[%c288_115, %c0_116] : memref<312x32xf32, #tpu.memory_space<vmem>>, vector<1x32xf32>
    %cst_117 = arith.constant dense<0.000000e+00> : vector<8x32xf32>
    %161 = tpu.matmul %156, %159, %cst_117 {dimension_numbers = #tpu.dot_dimension_numbers<[1], [0], [0], [1], [0, 0, 1, 1], [], []>} : vector<8x32xf32>, vector<32x32xf32>, vector<8x32xf32> -> vector<8x32xf32>
    %162 = vector.broadcast %160 : vector<1x32xf32> to vector<8x32xf32>
    %163 = arith.addf %161, %162 : vector<8x32xf32>
    %cst_118 = arith.constant 0.000000e+00 : f32
    %164 = vector.broadcast %cst_118 : f32 to vector<8x32xf32>
    %165 = arith.maximumf %163, %164 : vector<8x32xf32>
    %166 = arith.addf %158, %165 : vector<8x32xf32>
    %c0_119 = arith.constant 0 : index
    %c0_120 = arith.constant 0 : index
    %167 = vector.load %arg6[%c0_119, %c0_120] : memref<8x32xf32, #tpu.memory_space<vmem>>, vector<8x32xf32>
    tpu.vector_store %arg6[%c0_119, %c0_120], %166 {strides = array<i32>} : memref<8x32xf32, #tpu.memory_space<vmem>>, vector<8x32xf32>,
    %c144 = arith.constant 144 : index
    %c0_121 = arith.constant 0 : index
    %168 = vector.load %arg3[%c144, %c0_121] : memref<312x32xf32, #tpu.memory_space<vmem>>, vector<32x32xf32>
    %c240 = arith.constant 240 : index
    %c0_122 = arith.constant 0 : index
    %169 = vector.load %arg3[%c240, %c0_122] : memref<312x32xf32, #tpu.memory_space<vmem>>, vector<1x32xf32>
    %c0_123 = arith.constant 0 : index
    %c0_124 = arith.constant 0 : index
    %170 = vector.load %arg5[%c0_123, %c0_124] : memref<8x32xf32, #tpu.memory_space<vmem>>, vector<8x32xf32>
    %cst_125 = arith.constant dense<0.000000e+00> : vector<8x32xf32>
    %171 = tpu.matmul %170, %168, %cst_125 {dimension_numbers = #tpu.dot_dimension_numbers<[1], [0], [0], [1], [0, 0, 1, 1], [], []>} : vector<8x32xf32>, vector<32x32xf32>, vector<8x32xf32> -> vector<8x32xf32>
    %c0_126 = arith.constant 0 : index
    %c0_127 = arith.constant 0 : index
    %c0_128 = arith.constant 0 : index
    %172 = vector.load %arg7[%c0_126, %c0_127, %c0_128] : memref<1x8x8xf32, #tpu.memory_space<vmem>>, vector<1x8x8xf32>
    %173 = vector.shape_cast %172 : vector<1x8x8xf32> to vector<8x8xf32>
    %cst_129 = arith.constant dense<0.000000e+00> : vector<8x32xf32>
    %174 = tpu.matmul %173, %171, %cst_129 {dimension_numbers = #tpu.dot_dimension_numbers<[1], [0], [0], [1], [0, 0, 1, 1], [], []>} : vector<8x8xf32>, vector<8x32xf32>, vector<8x32xf32> -> vector<8x32xf32>
    %175 = vector.broadcast %169 : vector<1x32xf32> to vector<8x32xf32>
    %176 = arith.addf %174, %175 : vector<8x32xf32>
    %cst_130 = arith.constant 0.000000e+00 : f32
    %177 = vector.broadcast %cst_130 : f32 to vector<8x32xf32>
    %178 = arith.maximumf %176, %177 : vector<8x32xf32>
    %179 = arith.mulf %178, %178 : vector<8x32xf32>
    %cst_131 = arith.constant dense<0.000000e+00> : vector<8xf32>
    %180 = vector.multi_reduction <add>, %179, %cst_131 [1] : vector<8x32xf32> to vector<8xf32>
    %181 = vector.shape_cast %180 : vector<8xf32> to vector<8x1xf32>
    %cst_132 = arith.constant 1.000000e-24 : f32
    %182 = vector.broadcast %cst_132 : f32 to vector<8x1xf32>
    %183 = arith.maximumf %181, %182 : vector<8x1xf32>
    %184 = math.rsqrt %183 : vector<8x1xf32>
    %185 = vector.broadcast %184 : vector<8x1xf32> to vector<8x32xf32>
    %186 = arith.mulf %178, %185 : vector<8x32xf32>
    %c0_133 = arith.constant 0 : index
    %c0_134 = arith.constant 0 : index
    %187 = vector.load %arg5[%c0_133, %c0_134] : memref<8x32xf32, #tpu.memory_space<vmem>>, vector<8x32xf32>
    tpu.vector_store %arg5[%c0_133, %c0_134], %186 {strides = array<i32>} : memref<8x32xf32, #tpu.memory_space<vmem>>, vector<8x32xf32>,
    %c0_135 = arith.constant 0 : index
    %c0_136 = arith.constant 0 : index
    %188 = vector.load %arg6[%c0_135, %c0_136] : memref<8x32xf32, #tpu.memory_space<vmem>>, vector<8x32xf32>
    %c256_137 = arith.constant 256 : index
    %c0_138 = arith.constant 0 : index
    %189 = vector.load %arg3[%c256_137, %c0_138] : memref<312x32xf32, #tpu.memory_space<vmem>>, vector<32x32xf32>
    %c288_139 = arith.constant 288 : index
    %c0_140 = arith.constant 0 : index
    %190 = vector.load %arg3[%c288_139, %c0_140] : memref<312x32xf32, #tpu.memory_space<vmem>>, vector<1x32xf32>
    %cst_141 = arith.constant dense<0.000000e+00> : vector<8x32xf32>
    %191 = tpu.matmul %186, %189, %cst_141 {dimension_numbers = #tpu.dot_dimension_numbers<[1], [0], [0], [1], [0, 0, 1, 1], [], []>} : vector<8x32xf32>, vector<32x32xf32>, vector<8x32xf32> -> vector<8x32xf32>
    %192 = vector.broadcast %190 : vector<1x32xf32> to vector<8x32xf32>
    %193 = arith.addf %191, %192 : vector<8x32xf32>
    %cst_142 = arith.constant 0.000000e+00 : f32
    %194 = vector.broadcast %cst_142 : f32 to vector<8x32xf32>
    %195 = arith.maximumf %193, %194 : vector<8x32xf32>
    %196 = arith.addf %188, %195 : vector<8x32xf32>
    %c0_143 = arith.constant 0 : index
    %c0_144 = arith.constant 0 : index
    %197 = vector.load %arg6[%c0_143, %c0_144] : memref<8x32xf32, #tpu.memory_space<vmem>>, vector<8x32xf32>
    tpu.vector_store %arg6[%c0_143, %c0_144], %196 {strides = array<i32>} : memref<8x32xf32, #tpu.memory_space<vmem>>, vector<8x32xf32>,
    %c176 = arith.constant 176 : index
    %c0_145 = arith.constant 0 : index
    %198 = vector.load %arg3[%c176, %c0_145] : memref<312x32xf32, #tpu.memory_space<vmem>>, vector<32x32xf32>
    %c248 = arith.constant 248 : index
    %c0_146 = arith.constant 0 : index
    %199 = vector.load %arg3[%c248, %c0_146] : memref<312x32xf32, #tpu.memory_space<vmem>>, vector<1x32xf32>
    %c0_147 = arith.constant 0 : index
    %c0_148 = arith.constant 0 : index
    %200 = vector.load %arg5[%c0_147, %c0_148] : memref<8x32xf32, #tpu.memory_space<vmem>>, vector<8x32xf32>
    %cst_149 = arith.constant dense<0.000000e+00> : vector<8x32xf32>
    %201 = tpu.matmul %200, %198, %cst_149 {dimension_numbers = #tpu.dot_dimension_numbers<[1], [0], [0], [1], [0, 0, 1, 1], [], []>} : vector<8x32xf32>, vector<32x32xf32>, vector<8x32xf32> -> vector<8x32xf32>
    %c0_150 = arith.constant 0 : index
    %c0_151 = arith.constant 0 : index
    %c0_152 = arith.constant 0 : index
    %202 = vector.load %arg7[%c0_150, %c0_151, %c0_152] : memref<1x8x8xf32, #tpu.memory_space<vmem>>, vector<1x8x8xf32>
    %203 = vector.shape_cast %202 : vector<1x8x8xf32> to vector<8x8xf32>
    %cst_153 = arith.constant dense<0.000000e+00> : vector<8x32xf32>
    %204 = tpu.matmul %203, %201, %cst_153 {dimension_numbers = #tpu.dot_dimension_numbers<[1], [0], [0], [1], [0, 0, 1, 1], [], []>} : vector<8x8xf32>, vector<8x32xf32>, vector<8x32xf32> -> vector<8x32xf32>
    %205 = vector.broadcast %199 : vector<1x32xf32> to vector<8x32xf32>
    %206 = arith.addf %204, %205 : vector<8x32xf32>
    %cst_154 = arith.constant 0.000000e+00 : f32
    %207 = vector.broadcast %cst_154 : f32 to vector<8x32xf32>
    %208 = arith.maximumf %206, %207 : vector<8x32xf32>
    %c0_155 = arith.constant 0 : index
    %c0_156 = arith.constant 0 : index
    %209 = vector.load %arg5[%c0_155, %c0_156] : memref<8x32xf32, #tpu.memory_space<vmem>>, vector<8x32xf32>
    tpu.vector_store %arg5[%c0_155, %c0_156], %208 {strides = array<i32>} : memref<8x32xf32, #tpu.memory_space<vmem>>, vector<8x32xf32>,
    %c0_157 = arith.constant 0 : index
    %c0_158 = arith.constant 0 : index
    %210 = vector.load %arg6[%c0_157, %c0_158] : memref<8x32xf32, #tpu.memory_space<vmem>>, vector<8x32xf32>
    %c256_159 = arith.constant 256 : index
    %c0_160 = arith.constant 0 : index
    %211 = vector.load %arg3[%c256_159, %c0_160] : memref<312x32xf32, #tpu.memory_space<vmem>>, vector<32x32xf32>
    %c288_161 = arith.constant 288 : index
    %c0_162 = arith.constant 0 : index
    %212 = vector.load %arg3[%c288_161, %c0_162] : memref<312x32xf32, #tpu.memory_space<vmem>>, vector<1x32xf32>
    %cst_163 = arith.constant dense<0.000000e+00> : vector<8x32xf32>
    %213 = tpu.matmul %208, %211, %cst_163 {dimension_numbers = #tpu.dot_dimension_numbers<[1], [0], [0], [1], [0, 0, 1, 1], [], []>} : vector<8x32xf32>, vector<32x32xf32>, vector<8x32xf32> -> vector<8x32xf32>
    %214 = vector.broadcast %212 : vector<1x32xf32> to vector<8x32xf32>
    %215 = arith.addf %213, %214 : vector<8x32xf32>
    %cst_164 = arith.constant 0.000000e+00 : f32
    %216 = vector.broadcast %cst_164 : f32 to vector<8x32xf32>
    %217 = arith.maximumf %215, %216 : vector<8x32xf32>
    %218 = arith.addf %210, %217 : vector<8x32xf32>
    %c0_165 = arith.constant 0 : index
    %c0_166 = arith.constant 0 : index
    %219 = vector.load %arg6[%c0_165, %c0_166] : memref<8x32xf32, #tpu.memory_space<vmem>>, vector<8x32xf32>
    tpu.vector_store %arg6[%c0_165, %c0_166], %218 {strides = array<i32>} : memref<8x32xf32, #tpu.memory_space<vmem>>, vector<8x32xf32>,
    %c296 = arith.constant 296 : index
    %c0_167 = arith.constant 0 : index
    %220 = vector.load %arg3[%c296, %c0_167] : memref<312x32xf32, #tpu.memory_space<vmem>>, vector<1x32xf32>
    %c304 = arith.constant 304 : index
    %c0_168 = arith.constant 0 : index
    %221 = vector.load %arg3[%c304, %c0_168] : memref<312x32xf32, #tpu.memory_space<vmem>>, vector<1x32xf32>
    %222 = vector.extract_strided_slice %221 {offsets = [0, 0], sizes = [1, 1], strides = [1, 1]} : vector<1x32xf32> to vector<1x1xf32>
    %c0_169 = arith.constant 0 : index
    %c0_170 = arith.constant 0 : index
    %223 = vector.load %arg6[%c0_169, %c0_170] : memref<8x32xf32, #tpu.memory_space<vmem>>, vector<8x32xf32>
    "tpu.trace_start"() <{level = 10 : i32, message = "oh,nh->on"}> : () -> ()
    %cst_171 = arith.constant dense<0.000000e+00> : vector<1x8xf32>
    %224 = tpu.matmul %220, %223, %cst_171 {dimension_numbers = #tpu.dot_dimension_numbers<[1], [1], [0], [0], [0, 0, 1, 0], [], []>} : vector<1x32xf32>, vector<8x32xf32>, vector<1x8xf32> -> vector<1x8xf32>
    "tpu.trace_stop"() : () -> ()
    %cst_172 = arith.constant 7.000000e+00 : f32
    %225 = vector.broadcast %cst_172 : f32 to vector<1x1xf32>
    %226 = arith.mulf %225, %222 : vector<1x1xf32>
    %227 = vector.broadcast %226 : vector<1x1xf32> to vector<1x8xf32>
    %228 = arith.addf %224, %227 : vector<1x8xf32>
    %c0_173 = arith.constant 0 : index
    %c0_174 = arith.constant 0 : index
    %c0_175 = arith.constant 0 : index
    %229 = vector.load %arg4[%c0_173, %c0_174, %c0_175] : memref<1x1x8xf32, #tpu.memory_space<vmem>>, vector<1x1x8xf32>
    %230 = vector.shape_cast %229 : vector<1x1x8xf32> to vector<1x8xf32>
    %231 = vector.shape_cast %228 : vector<1x8xf32> to vector<1x1x8xf32>
    tpu.vector_store %arg4[%c0_173, %c0_174, %c0_175], %231 {strides = array<i32>} : memref<1x1x8xf32, #tpu.memory_space<vmem>>, vector<1x1x8xf32>,
    return
  }
  func.func @transform_0(%arg0: i32) -> (i32, i32, i32) {
    %c0_i32 = arith.constant 0 : i32
    %c0_i32_0 = arith.constant 0 : i32
    %c0_i32_1 = arith.constant 0 : i32
    return %arg0, %c0_i32, %c0_i32_0 : i32, i32, i32
  }
  func.func @transform_1(%arg0: i32) -> (i32, i32, i32) {
    %c0_i32 = arith.constant 0 : i32
    %c0_i32_0 = arith.constant 0 : i32
    %c0_i32_1 = arith.constant 0 : i32
    return %arg0, %c0_i32, %c0_i32_0 : i32, i32, i32
  }
  func.func @transform_2(%arg0: i32) -> (i32, i32) {
    %c0_i32 = arith.constant 0 : i32
    %c0_i32_0 = arith.constant 0 : i32
    %c0_i32_1 = arith.constant 0 : i32
    return %c0_i32, %c0_i32_0 : i32, i32
  }
  func.func @transform_3(%arg0: i32) -> (i32, i32, i32) {
    %c0_i32 = arith.constant 0 : i32
    %c0_i32_0 = arith.constant 0 : i32
    %c0_i32_1 = arith.constant 0 : i32
    return %arg0, %c0_i32, %c0_i32_0 : i32, i32, i32
  }
}

</mosaic_0001>

<bundles_post_ra>
// kernel: tpu_custom_call.1
= control target key start
LH: loop header
LB: loop body
LE: loop exit
PB: predicated region body
PF: predicated region fallthrough
CT: control target
= control target key end

     0   :  { %vm27_vm0 = vcmask 64512   ;;  %v2233_v2 = vmov 0.0   ;;  %vm2234_vm1 = vmmov 0   ;;  %s2592_s0 = inlined_call_operand.vmem [shape: f32[1,8,8], index: 0, kind: input, shape index: {}]   ;;  %s2593_s1 = inlined_call_operand.vmem [shape: f32[1,8,8], index: 1, kind: input, shape index: {}]   ;;  %s2594_s2 = inlined_call_operand.vmem [shape: f32[312,32], index: 2, kind: input, shape index: {}]   ;;  %s2595_s3 = inlined_call_operand.hbm [shape: f32[1,1,8], index: 3, kind: output, shape index: {}]  }
   0x1   :  { %v103_v0 = vld [vmem:[%s2594_s2] sm:$0xff]  ;;  %2010 = vmatprep.subr.mxu1 %v2233_v2  ;;  %2012 = vmatprep.mubr.msk.f32.mxu1 %vm2234_vm1, %v2233_v2 }
   0x2   :  { %v105_v1 = vld [vmem:[%s2592_s0] sm:$0xff] }
   0x3   :  { %8 = vsyncpa [#allocation6], 0  ;;  %2011 = vmatpush3.msra.mxu1 %v103_v0  ;;  %2005 = vmatprep.subr.mxu0 %v2233_v2  ;;  %v1886_v3 = vld [vmem:[%s2594_s2 + $0x8] ss:$0 sm:$0xff]  ;;  %vm185_vm2 = vcmask 261120   ;;  %v15_v10 = vlaneseq  ;;  %v26_v14 = vld [vmem:[%s2593_s1] sm:$0xff] }
   0x4   :  { %2013 = vmatmul.mubr.msk.f32.vlgmr.msra.gmra.mxu1 %vm27_vm0, %v105_v1  ;;  %2007 = vmatprep.mubr.msk.f32.mxu0 %vm2234_vm1, %v2233_v2  ;;  %v2284_v15 = vld [vmem:[%s2594_s2 + $0x118] sm:$0xff]  ;;  %v2235_v16 = vmov 1.0   ;;  %v2291_v17 = vld [vmem:[%s2594_s2 + $0x110] sm:$0xff]  ;;  %v2300_v18 = vld [vmem:[%s2594_s2 + $0x108] sm:$0xff]  ;;  %s2237_s7 = smov [#allocation5]   ;;  %vm1867_vm5 = vcmask 57344  }
   0x5   :  { %2026 = vmatprep.subr.mxu1 %v2233_v2  ;;  %2034 = vmatprep.mubr.msk.f32.mxu1 %vm2234_vm1, %v2233_v2  ;;  %v16_v11 = vand.u32 127, %v15_v10  ;;  %v19_v12 = vshrl.u32 %v15_v10, 7  ;;  %v2307_v19 = vld [vmem:[%s2594_s2 + $0x100] sm:$0xff]  ;;  %v280_v20 = vld [vmem:[%s2594_s2 + $0x28] sm:$0xff]  ;;  %v278_v22 = vld [vmem:[%s2594_s2 + $0x18] sm:$0xff]  ;;  %s1875_s8 = sshll.u32 %s2237_s7, 4  ;;  %s1876_s8 = int_to_ptr.vmem [resolvable:$true] %s1875_s8 }
   0x6   :  { %v279_v21 = vld [vmem:[%s2594_s2 + $0x20] sm:$0xff]  ;;  %2027 = vmatpush3.msra.mxu1 %v280_v20  ;;  %v277_v23 = vld [vmem:[%s2594_s2 + $0x10] sm:$0xff]  ;;  %v532_v50 = vld [vmem:[%s2594_s2 + $0x48] sm:$0xff]  ;;  %s2211_s9 = scalar_lea.vmem %s1876_s8, 16  ;;  %s2215_s10 = scalar_lea.vmem %s1876_s8, 32 }
   0x7   :  { %v17_v13 = vand.u32 7, %v16_v11  ;;  %2028 = vmatprep.subr.mxu1 %v2233_v2  ;;  %v23_v24 = vshra.s32 %v19_v12, 3  ;;  %v24_v25 = vshra.s32 %v16_v11, 3  ;;  %v2354_v35 = vld [vmem:[%s2594_s2 + $0x120] ss:$0 sm:$0xff]  ;;  %v530_v52 = vld [vmem:[%s2594_s2 + $0x38] sm:$0xff]  ;;  %p2212_p0 = scmp.ne.s32.totalorder %s1876_s8, %s2211_s9  ;;  %p2216_p1 = scmp.lt.s32.totalorder %s1876_s8, %s1876_s8 }
   0x8   :  { %2029 = vmatpush3.msra.mxu1 %v279_v21  ;;  %v1891_v43 = vld [vmem:[%s2594_s2 + $0xd0] ss:$0 sm:$0xff]  ;;  %v531_v51 = vld [vmem:[%s2594_s2 + $0x40] sm:$0xff]  ;;  %v784_v11 = vld [vmem:[%s2594_s2 + $0x68] sm:$0xff]  ;;  %p2217_p2 = scmp.lt.s32.totalorder %s2215_s10, %s2211_s9 }
   0x9   :  { %vm20_vm3 = vcmp.eq.s32.totalorder %v17_v13, %v19_v12  ;;  %2030 = vmatprep.subr.mxu1 %v2233_v2  ;;  %vm2329_vm4 = vcmp.eq.s32.totalorder %v23_v24, %v24_v25  ;;  %v529_v53 = vld [vmem:[%s2594_s2 + $0x30] sm:$0xff]  ;;  %v783_v12 = vld [vmem:[%s2594_s2 + $0x60] sm:$0xff]  ;;  %v782_v13 = vld [vmem:[%s2594_s2 + $0x58] sm:$0xff] }
   0xa   :  { %2006 = vmatpush3.msk.msra.mxu0 %vm20_vm3, %v2235_v16  ;;  %2031 = vmatpush3.msra.mxu1 %v278_v22  ;;  %p2218_p3 = por %p2217_p2, %p2216_p1 }
   0xb   :  { %2015 = vmatprep.subr.mxu0 %v2233_v2  ;;  %2008 = vmatmul.mubr.msk.f32.vlgmr.msra.gmra.mxu0 %vm27_vm0, %v26_v14  ;;  %v781_v14 = vld [vmem:[%s2594_s2 + $0x50] sm:$0xff] }
   0xc   :  { %2016 = vmatpush3.msra.mxu0 %v2284_v15  ;;  %2023 = vmatprep.mubr.msk.f32.mxu0 %vm2234_vm1, %v2233_v2  ;;  %p2219_p4 = pnand %p2218_p3, %p2212_p0 }
   0xd   :  { %2017 = vmatprep.subr.mxu0 %v2233_v2  ;;  %2032 = vmatprep.subr.mxu1 %v2233_v2 }
   0xe   :  { %2018 = vmatpush3.msra.mxu0 %v2291_v17  ;;  %2033 = vmatpush3.msra.mxu1 %v277_v23 }
   0xf   :  { %2019 = vmatprep.subr.mxu0 %v2233_v2  ;;  %2042 = vmatprep.subr.mxu1 %v2233_v2 }
  0x10   :  { %2020 = vmatpush3.msra.mxu0 %v2300_v18 }
  0x11   :  { %2021 = vmatprep.subr.mxu0 %v2233_v2 }
  0x12   :  { %2022 = vmatpush3.msra.mxu0 %v2307_v19 }
  0x13   :  { %2037 = vmatprep.subr.mxu0 %v2233_v2 }
  0xc4   :  { %v179_v4 = vpop.f32.mrf.mxu1 }
  0xc5   :  { %v180_v5 = vadd.f32 %v1886_v3, %v179_v4  ;;  %v1896_v4 = vld [vmem:[%s2594_s2 + $0xd8] ss:$0 sm:$0xff] }
  0xc6   :  { %v2014_v6 = vpop.f32.mrf.mxu1 }
  0xc7   :  { %v183_v7 = vmax.f32 %v180_v5, 0.0 }
  0xc9   :  { %v184_v8 = vmul.f32 %v183_v7, %v183_v7 }
  0xcb   :  { %v186_v9 = vsel %vm185_vm2, %v184_v8, 0.0  ;;  %v97_v32 = vpop.f32.mrf.mxu0 }
  0xcc   :  { %187 = vadd.xlane.f32.xlu0 %v186_v9  ;;  %v101_v33 = vsel %vm2329_vm4, %v97_v32, 0.0  ;;  %v1901_v32 = vld [vmem:[%s2594_s2 + $0xe0] ss:$0 sm:$0xff] }
  0xcd   :  { %102 = vst.msk [vmem:[#allocation4] sm:$0xff] %vm27_vm0, %v101_v33  ;;  %v2009_v34 = vpop.f32.mrf.mxu0 }
  0xd4   :  { %v2358_v40 = vld [vmem:[#allocation4] sm:$0xff] }
 0x155   :  { %v188_v27 = vpop.xlane.xlu0 %187 }
 0x156   :  { %v189_v28 = vmax.f32 %v188_v27, 1e-24 }
 0x158   :  { %2199 = vrsqrt.f32 %v189_v28 }
 0x165   :  { %v2200_v29 = vpop.eup %2199 }
 0x166   :  { %v191_v30 = vmul.f32 %v2200_v29, %v183_v7 }
 0x168   :  { %192 = vst.msk [vmem:[#allocation2] sm:$0xff] %vm185_vm2, %v191_v30  ;;  %2024 = vmatmul.mubr.msk.f32.vlgmr.msra.gmra.mxu0 %vm185_vm2, %v191_v30 }
 0x169   :  { %2039 = vmatprep.mubr.msk.f32.mxu0 %vm2234_vm1, %v2233_v2 }
 0x16f   :  { %v282_v31 = vld [vmem:[#allocation2] sm:$0xff] }
 0x170   :  { %2035 = vmatmul.mubr.msk.f32.vlgmr.msra.gmra.mxu1 %vm185_vm2, %v282_v31 }
 0x171   :  { %2043 = vmatpush3.msra.mxu1 %v2284_v15  ;;  %2050 = vmatprep.mubr.msk.f32.mxu1 %vm2234_vm1, %v2233_v2 }
 0x172   :  { %2044 = vmatprep.subr.mxu1 %v2233_v2 }
 0x173   :  { %2045 = vmatpush3.msra.mxu1 %v2291_v17 }
 0x174   :  { %2046 = vmatprep.subr.mxu1 %v2233_v2 }
 0x175   :  { %2047 = vmatpush3.msra.mxu1 %v2300_v18 }
 0x176   :  { %2048 = vmatprep.subr.mxu1 %v2233_v2 }
 0x177   :  { %2049 = vmatpush3.msra.mxu1 %v2307_v19 }
 0x178   :  { %2064 = vmatprep.subr.mxu1 %v2233_v2 }
 0x228   :  { %v271_v36 = vpop.f32.mrf.mxu0 }
 0x229   :  { %v272_v37 = vadd.f32 %v2354_v35, %v271_v36 }
 0x22a   :  { %v2025_v38 = vpop.f32.mrf.mxu0 }
 0x22b   :  { %v275_v39 = vmax.f32 %v272_v37, 0.0 }
 0x22d   :  { %276 = vst.msk [vmem:[#allocation3] sm:$0xff] %vm185_vm2, %v275_v39 }
 0x230   :  { %v352_v41 = vpop.f32.mrf.mxu1 }
 0x231   :  { %2038 = vmatpush3.msra.mxu0 %v352_v41  ;;  %v1036_v41 = vld [vmem:[%s2594_s2 + $0x88] sm:$0xff] }
 0x232   :  { %v2036_v42 = vpop.f32.mrf.mxu1  ;;  %2040 = vmatmul.mubr.msk.f32.vlgmr.msra.gmra.mxu0 %vm27_vm0, %v2358_v40  ;;  %2053 = vmatprep.subr.mxu0 %v2233_v2 }
 0x233   :  { %2061 = vmatprep.mubr.msk.f32.mxu0 %vm2234_vm1, %v2233_v2  ;;  %2054 = vmatpush3.msra.mxu0 %v532_v50  ;;  %v1035_v42 = vld [vmem:[%s2594_s2 + $0x80] sm:$0xff] }
 0x234   :  { %2055 = vmatprep.subr.mxu0 %v2233_v2  ;;  %v443_v63 = vld [vmem:[#allocation3] sm:$0xff] }
 0x235   :  { %2056 = vmatpush3.msra.mxu0 %v531_v51 }
 0x236   :  { %2057 = vmatprep.subr.mxu0 %v2233_v2 }
 0x237   :  { %2058 = vmatpush3.msra.mxu0 %v530_v52 }
 0x238   :  { %2059 = vmatprep.subr.mxu0 %v2233_v2 }
 0x239   :  { %2060 = vmatpush3.msra.mxu0 %v529_v53 }
 0x23a   :  { %2069 = vmatprep.subr.mxu0 %v2233_v2 }
 0x2f2   :  { %v430_v44 = vpop.f32.mrf.mxu0 }
 0x2f3   :  { %v431_v45 = vadd.f32 %v1891_v43, %v430_v44  ;;  %v1034_v43 = vld [vmem:[%s2594_s2 + $0x78] sm:$0xff]  ;;  %v1033_v44 = vld [vmem:[%s2594_s2 + $0x70] sm:$0xff] }
 0x2f4   :  { %v2041_v46 = vpop.f32.mrf.mxu0 }
 0x2f5   :  { %v434_v47 = vmax.f32 %v431_v45, 0.0 }
 0x2f7   :  { %v435_v48 = vmul.f32 %v434_v47, %v434_v47 }
 0x2f9   :  { %v436_v49 = vsel %vm185_vm2, %v435_v48, 0.0 }
 0x2fa   :  { %437 = vadd.xlane.f32.xlu0 %v436_v49 }
 0x383   :  { %v438_v54 = vpop.xlane.xlu0 %437 }
 0x384   :  { %v439_v55 = vmax.f32 %v438_v54, 1e-24 }
 0x386   :  { %2201 = vrsqrt.f32 %v439_v55 }
 0x393   :  { %v2202_v56 = vpop.eup %2201 }
 0x394   :  { %v441_v57 = vmul.f32 %v2202_v56, %v434_v47 }
 0x396   :  { %442 = vst.msk [vmem:[#allocation2] sm:$0xff] %vm185_vm2, %v441_v57  ;;  %2051 = vmatmul.mubr.msk.f32.vlgmr.msra.gmra.mxu1 %vm185_vm2, %v441_v57 }
 0x397   :  { %2066 = vmatprep.mubr.msk.f32.mxu1 %vm2234_vm1, %v2233_v2 }
 0x39d   :  { %v534_v58 = vld [vmem:[#allocation2] sm:$0xff] }
 0x39e   :  { %2062 = vmatmul.mubr.msk.f32.vlgmr.msra.gmra.mxu0 %vm185_vm2, %v534_v58  ;;  %v1906_v58 = vld [vmem:[%s2594_s2 + $0xe8] ss:$0 sm:$0xff] }
 0x39f   :  { %2070 = vmatpush3.msra.mxu0 %v2284_v15  ;;  %2077 = vmatprep.mubr.msk.f32.mxu0 %vm2234_vm1, %v2233_v2 }
 0x3a0   :  { %2071 = vmatprep.subr.mxu0 %v2233_v2 }
 0x3a1   :  { %2072 = vmatpush3.msra.mxu0 %v2291_v17 }
 0x3a2   :  { %2073 = vmatprep.subr.mxu0 %v2233_v2 }
 0x3a3   :  { %2074 = vmatpush3.msra.mxu0 %v2300_v18 }
 0x3a4   :  { %2075 = vmatprep.subr.mxu0 %v2233_v2 }
 0x3a5   :  { %2076 = vmatpush3.msra.mxu0 %v2307_v19 }
 0x3a6   :  { %2091 = vmatprep.subr.mxu0 %v2233_v2 }
 0x456   :  { %v522_v59 = vpop.f32.mrf.mxu1 }
 0x457   :  { %v523_v60 = vadd.f32 %v2354_v35, %v522_v59 }
 0x458   :  { %v2052_v61 = vpop.f32.mrf.mxu1 }
 0x459   :  { %v526_v62 = vmax.f32 %v523_v60, 0.0 }
 0x45b   :  { %v527_v0 = vadd.f32 %v526_v62, %v443_v63 }
 0x45d   :  { %528 = vst.msk [vmem:[#allocation3] sm:$0xff] %vm185_vm2, %v527_v0 }
 0x45e   :  { %v604_v1 = vpop.f32.mrf.mxu0 }
 0x45f   :  { %2065 = vmatpush3.msra.mxu1 %v604_v1  ;;  %v1288_v1 = vld [vmem:[%s2594_s2 + $0xa8] sm:$0xff] }
 0x460   :  { %v2063_v3 = vpop.f32.mrf.mxu0  ;;  %2067 = vmatmul.mubr.msk.f32.vlgmr.msra.gmra.mxu1 %vm27_vm0, %v2358_v40  ;;  %2080 = vmatprep.subr.mxu1 %v2233_v2 }
 0x461   :  { %2088 = vmatprep.mubr.msk.f32.mxu1 %vm2234_vm1, %v2233_v2  ;;  %2081 = vmatpush3.msra.mxu1 %v784_v11  ;;  %v1287_v3 = vld [vmem:[%s2594_s2 + $0xa0] sm:$0xff] }
 0x462   :  { %2082 = vmatprep.subr.mxu1 %v2233_v2 }
 0x463   :  { %2083 = vmatpush3.msra.mxu1 %v783_v12 }
 0x464   :  { %2084 = vmatprep.subr.mxu1 %v2233_v2  ;;  %v695_v28 = vld [vmem:[#allocation3] sm:$0xff] }
 0x465   :  { %2085 = vmatpush3.msra.mxu1 %v782_v13 }
 0x466   :  { %2086 = vmatprep.subr.mxu1 %v2233_v2 }
 0x467   :  { %2087 = vmatpush3.msra.mxu1 %v781_v14 }
 0x468   :  { %2096 = vmatprep.subr.mxu1 %v2233_v2 }
 0x520   :  { %v682_v5 = vpop.f32.mrf.mxu1 }
 0x521   :  { %v683_v6 = vadd.f32 %v1896_v4, %v682_v5  ;;  %v1286_v4 = vld [vmem:[%s2594_s2 + $0x98] sm:$0xff]  ;;  %v1285_v5 = vld [vmem:[%s2594_s2 + $0x90] sm:$0xff] }
 0x522   :  { %v2068_v7 = vpop.f32.mrf.mxu1 }
 0x523   :  { %v686_v8 = vmax.f32 %v683_v6, 0.0 }
 0x525   :  { %v687_v9 = vmul.f32 %v686_v8, %v686_v8 }
 0x527   :  { %v688_v10 = vsel %vm185_vm2, %v687_v9, 0.0 }
 0x528   :  { %689 = vadd.xlane.f32.xlu1 %v688_v10 }
 0x5b1   :  { %v690_v16 = vpop.xlane.xlu1 %689 }
 0x5b2   :  { %v691_v20 = vmax.f32 %v690_v16, 1e-24 }
 0x5b4   :  { %2203 = vrsqrt.f32 %v691_v20 }
 0x5c1   :  { %v2204_v21 = vpop.eup %2203 }
 0x5c2   :  { %v693_v22 = vmul.f32 %v2204_v21, %v686_v8 }
 0x5c4   :  { %694 = vst.msk [vmem:[#allocation2] sm:$0xff] %vm185_vm2, %v693_v22  ;;  %2078 = vmatmul.mubr.msk.f32.vlgmr.msra.gmra.mxu0 %vm185_vm2, %v693_v22 }
 0x5c5   :  { %2093 = vmatprep.mubr.msk.f32.mxu0 %vm2234_vm1, %v2233_v2 }
 0x5cb   :  { %v786_v23 = vld [vmem:[#allocation2] sm:$0xff] }
 0x5cc   :  { %2089 = vmatmul.mubr.msk.f32.vlgmr.msra.gmra.mxu1 %vm185_vm2, %v786_v23  ;;  %v1911_v23 = vld [vmem:[%s2594_s2 + $0xf0] ss:$0 sm:$0xff] }
 0x5cd   :  { %2097 = vmatpush3.msra.mxu1 %v2284_v15  ;;  %2104 = vmatprep.mubr.msk.f32.mxu1 %vm2234_vm1, %v2233_v2 }
 0x5ce   :  { %2098 = vmatprep.subr.mxu1 %v2233_v2 }
 0x5cf   :  { %2099 = vmatpush3.msra.mxu1 %v2291_v17 }
 0x5d0   :  { %2100 = vmatprep.subr.mxu1 %v2233_v2 }
 0x5d1   :  { %2101 = vmatpush3.msra.mxu1 %v2300_v18 }
 0x5d2   :  { %2102 = vmatprep.subr.mxu1 %v2233_v2 }
 0x5d3   :  { %2103 = vmatpush3.msra.mxu1 %v2307_v19 }
 0x5d4   :  { %2118 = vmatprep.subr.mxu1 %v2233_v2 }
 0x684   :  { %v774_v24 = vpop.f32.mrf.mxu0 }
 0x685   :  { %v775_v25 = vadd.f32 %v2354_v35, %v774_v24 }
 0x686   :  { %v2079_v26 = vpop.f32.mrf.mxu0 }
 0x687   :  { %v778_v27 = vmax.f32 %v775_v25, 0.0 }
 0x689   :  { %v779_v29 = vadd.f32 %v778_v27, %v695_v28 }
 0x68b   :  { %780 = vst.msk [vmem:[#allocation3] sm:$0xff] %vm185_vm2, %v779_v29 }
 0x68c   :  { %v856_v30 = vpop.f32.mrf.mxu1 }
 0x68d   :  { %2092 = vmatpush3.msra.mxu0 %v856_v30  ;;  %v1540_v30 = vld [vmem:[%s2594_s2 + $0xc8] sm:$0xff] }
 0x68e   :  { %v2090_v31 = vpop.f32.mrf.mxu1  ;;  %2094 = vmatmul.mubr.msk.f32.vlgmr.msra.gmra.mxu0 %vm27_vm0, %v2358_v40  ;;  %2107 = vmatprep.subr.mxu0 %v2233_v2 }
 0x68f   :  { %2115 = vmatprep.mubr.msk.f32.mxu0 %vm2234_vm1, %v2233_v2  ;;  %2108 = vmatpush3.msra.mxu0 %v1036_v41  ;;  %v1539_v31 = vld [vmem:[%s2594_s2 + $0xc0] sm:$0xff] }
 0x690   :  { %2109 = vmatprep.subr.mxu0 %v2233_v2 }
 0x691   :  { %2110 = vmatpush3.msra.mxu0 %v1035_v42 }
 0x692   :  { %2111 = vmatprep.subr.mxu0 %v2233_v2  ;;  %v947_v54 = vld [vmem:[#allocation3] sm:$0xff] }
 0x693   :  { %2112 = vmatpush3.msra.mxu0 %v1034_v43 }
 0x694   :  { %2113 = vmatprep.subr.mxu0 %v2233_v2 }
 0x695   :  { %2114 = vmatpush3.msra.mxu0 %v1033_v44 }
 0x696   :  { %2123 = vmatprep.subr.mxu0 %v2233_v2 }
 0x74e   :  { %v934_v33 = vpop.f32.mrf.mxu0 }
 0x74f   :  { %v935_v34 = vadd.f32 %v1901_v32, %v934_v33  ;;  %v1538_v32 = vld [vmem:[%s2594_s2 + $0xb8] sm:$0xff]  ;;  %v1537_v33 = vld [vmem:[%s2594_s2 + $0xb0] sm:$0xff] }
 0x750   :  { %v2095_v36 = vpop.f32.mrf.mxu0 }
 0x751   :  { %v938_v37 = vmax.f32 %v935_v34, 0.0 }
 0x753   :  { %v939_v38 = vmul.f32 %v938_v37, %v938_v37 }
 0x755   :  { %v940_v39 = vsel %vm185_vm2, %v939_v38, 0.0 }
 0x756   :  { %941 = vadd.xlane.f32.xlu1 %v940_v39 }
 0x7df   :  { %v942_v45 = vpop.xlane.xlu1 %941 }
 0x7e0   :  { %v943_v46 = vmax.f32 %v942_v45, 1e-24 }
 0x7e2   :  { %2205 = vrsqrt.f32 %v943_v46 }
 0x7ef   :  { %v2206_v47 = vpop.eup %2205 }
 0x7f0   :  { %v945_v48 = vmul.f32 %v2206_v47, %v938_v37 }
 0x7f2   :  { %946 = vst.msk [vmem:[#allocation2] sm:$0xff] %vm185_vm2, %v945_v48  ;;  %2105 = vmatmul.mubr.msk.f32.vlgmr.msra.gmra.mxu1 %vm185_vm2, %v945_v48 }
 0x7f3   :  { %2120 = vmatprep.mubr.msk.f32.mxu1 %vm2234_vm1, %v2233_v2 }
 0x7f9   :  { %v1038_v49 = vld [vmem:[#allocation2] sm:$0xff] }
 0x7fa   :  { %2116 = vmatmul.mubr.msk.f32.vlgmr.msra.gmra.mxu0 %vm185_vm2, %v1038_v49 }
 0x7fb   :  { %2124 = vmatpush3.msra.mxu0 %v2284_v15  ;;  %2131 = vmatprep.mubr.msk.f32.mxu0 %vm2234_vm1, %v2233_v2 }
 0x7fc   :  { %2125 = vmatprep.subr.mxu0 %v2233_v2 }
 0x7fd   :  { %2126 = vmatpush3.msra.mxu0 %v2291_v17 }
 0x7fe   :  { %2127 = vmatprep.subr.mxu0 %v2233_v2 }
 0x7ff   :  { %2128 = vmatpush3.msra.mxu0 %v2300_v18 }
 0x800   :  { %2129 = vmatprep.subr.mxu0 %v2233_v2 }
 0x801   :  { %2130 = vmatpush3.msra.mxu0 %v2307_v19 }
 0x802   :  { %2145 = vmatprep.subr.mxu0 %v2233_v2 }
 0x8b2   :  { %v1026_v50 = vpop.f32.mrf.mxu1 }
 0x8b3   :  { %v1027_v51 = vadd.f32 %v2354_v35, %v1026_v50  ;;  %v2236_v50 = vmov 0  }
 0x8b4   :  { %v2106_v52 = vpop.f32.mrf.mxu1  ;;  %2198 = vset.pattern.permute.xlu0 %v2236_v50 }
 0x8b5   :  { %v1030_v53 = vmax.f32 %v1027_v51, 0.0 }
 0x8b7   :  { %v1031_v55 = vadd.f32 %v1030_v53, %v947_v54 }
 0x8b9   :  { %1032 = vst.msk [vmem:[#allocation3] sm:$0xff] %vm185_vm2, %v1031_v55 }
 0x8ba   :  { %v1108_v56 = vpop.f32.mrf.mxu0 }
 0x8bb   :  { %2119 = vmatpush3.msra.mxu1 %v1108_v56 }
 0x8bc   :  { %v2117_v57 = vpop.f32.mrf.mxu0  ;;  %2121 = vmatmul.mubr.msk.f32.vlgmr.msra.gmra.mxu1 %vm27_vm0, %v2358_v40  ;;  %2134 = vmatprep.subr.mxu1 %v2233_v2 }
 0x8bd   :  { %2142 = vmatprep.mubr.msk.f32.mxu1 %vm2234_vm1, %v2233_v2  ;;  %2135 = vmatpush3.msra.mxu1 %v1288_v1 }
 0x8be   :  { %2136 = vmatprep.subr.mxu1 %v2233_v2 }
 0x8bf   :  { %2137 = vmatpush3.msra.mxu1 %v1287_v3 }
 0x8c0   :  { %2138 = vmatprep.subr.mxu1 %v2233_v2  ;;  %v1199_v16 = vld [vmem:[#allocation3] sm:$0xff] }
 0x8c1   :  { %2139 = vmatpush3.msra.mxu1 %v1286_v4 }
 0x8c2   :  { %2140 = vmatprep.subr.mxu1 %v2233_v2 }
 0x8c3   :  { %2141 = vmatpush3.msra.mxu1 %v1285_v5 }
 0x8c4   :  { %2150 = vmatprep.subr.mxu1 %v2233_v2 }
 0x97c   :  { %v1186_v59 = vpop.f32.mrf.mxu1 }
 0x97d   :  { %v1187_v60 = vadd.f32 %v1906_v58, %v1186_v59  ;;  %v1782_v58 = vld [vmem:[%s2594_s2 + $0x128] sm:$0x1] }
 0x97e   :  { %v2122_v61 = vpop.f32.mrf.mxu1 }
 0x97f   :  { %v1190_v62 = vmax.f32 %v1187_v60, 0.0 }
 0x981   :  { %v1191_v63 = vmul.f32 %v1190_v62, %v1190_v62 }
 0x983   :  { %v1192_v0 = vsel %vm185_vm2, %v1191_v63, 0.0 }
 0x984   :  { %1193 = vadd.xlane.f32.xlu0 %v1192_v0 }
 0xa0d   :  { %v1194_v6 = vpop.xlane.xlu0 %1193 }
 0xa0e   :  { %v1195_v7 = vmax.f32 %v1194_v6, 1e-24 }
 0xa10   :  { %2207 = vrsqrt.f32 %v1195_v7 }
 0xa1d   :  { %v2208_v8 = vpop.eup %2207 }
 0xa1e   :  { %v1197_v9 = vmul.f32 %v2208_v8, %v1190_v62 }
 0xa20   :  { %1198 = vst.msk [vmem:[#allocation2] sm:$0xff] %vm185_vm2, %v1197_v9  ;;  %2132 = vmatmul.mubr.msk.f32.vlgmr.msra.gmra.mxu0 %vm185_vm2, %v1197_v9 }
 0xa21   :  { %2147 = vmatprep.mubr.msk.f32.mxu0 %vm2234_vm1, %v2233_v2 }
 0xa27   :  { %v1290_v10 = vld [vmem:[#allocation2] sm:$0xff] }
 0xa28   :  { %2143 = vmatmul.mubr.msk.f32.vlgmr.msra.gmra.mxu1 %vm185_vm2, %v1290_v10 }
 0xa29   :  { %2151 = vmatpush3.msra.mxu1 %v2284_v15  ;;  %2158 = vmatprep.mubr.msk.f32.mxu1 %vm2234_vm1, %v2233_v2 }
 0xa2a   :  { %2152 = vmatprep.subr.mxu1 %v2233_v2 }
 0xa2b   :  { %2153 = vmatpush3.msra.mxu1 %v2291_v17 }
 0xa2c   :  { %2154 = vmatprep.subr.mxu1 %v2233_v2 }
 0xa2d   :  { %2155 = vmatpush3.msra.mxu1 %v2300_v18 }
 0xa2e   :  { %2156 = vmatprep.subr.mxu1 %v2233_v2 }
 0xa2f   :  { %2157 = vmatpush3.msra.mxu1 %v2307_v19 }
 0xa30   :  { %2172 = vmatprep.subr.mxu1 %v2233_v2 }
 0xae0   :  { %v1278_v11 = vpop.f32.mrf.mxu0 }
 0xae1   :  { %v1279_v12 = vadd.f32 %v2354_v35, %v1278_v11 }
 0xae2   :  { %v2133_v13 = vpop.f32.mrf.mxu0 }
 0xae3   :  { %v1282_v14 = vmax.f32 %v1279_v12, 0.0 }
 0xae5   :  { %v1283_v20 = vadd.f32 %v1282_v14, %v1199_v16 }
 0xae7   :  { %1284 = vst.msk [vmem:[#allocation3] sm:$0xff] %vm185_vm2, %v1283_v20 }
 0xae8   :  { %v1360_v21 = vpop.f32.mrf.mxu1 }
 0xae9   :  { %2146 = vmatpush3.msra.mxu0 %v1360_v21 }
 0xaea   :  { %v2144_v22 = vpop.f32.mrf.mxu1  ;;  %2148 = vmatmul.mubr.msk.f32.vlgmr.msra.gmra.mxu0 %vm27_vm0, %v2358_v40  ;;  %2161 = vmatprep.subr.mxu0 %v2233_v2 }
 0xaeb   :  { %2169 = vmatprep.mubr.msk.f32.mxu0 %vm2234_vm1, %v2233_v2  ;;  %2162 = vmatpush3.msra.mxu0 %v1540_v30 }
 0xaec   :  { %2163 = vmatprep.subr.mxu0 %v2233_v2 }
 0xaed   :  { %2164 = vmatpush3.msra.mxu0 %v1539_v31 }
 0xaee   :  { %2165 = vmatprep.subr.mxu0 %v2233_v2  ;;  %v1451_v44 = vld [vmem:[#allocation3] sm:$0xff] }
 0xaef   :  { %2166 = vmatpush3.msra.mxu0 %v1538_v32 }
 0xaf0   :  { %2167 = vmatprep.subr.mxu0 %v2233_v2 }
 0xaf1   :  { %2168 = vmatpush3.msra.mxu0 %v1537_v33 }
 0xaf2   :  { %2177 = vmatprep.subr.mxu0 %v2233_v2 }
 0xbaa   :  { %v1438_v24 = vpop.f32.mrf.mxu0 }
 0xbab   :  { %v1439_v25 = vadd.f32 %v1911_v23, %v1438_v24 }
 0xbac   :  { %v2149_v26 = vpop.f32.mrf.mxu0 }
 0xbad   :  { %v1442_v27 = vmax.f32 %v1439_v25, 0.0 }
 0xbaf   :  { %v1443_v28 = vmul.f32 %v1442_v27, %v1442_v27 }
 0xbb1   :  { %v1444_v29 = vsel %vm185_vm2, %v1443_v28, 0.0 }
 0xbb2   :  { %1445 = vadd.xlane.f32.xlu1 %v1444_v29 }
 0xc3b   :  { %v1446_v34 = vpop.xlane.xlu1 %1445 }
 0xc3c   :  { %v1447_v36 = vmax.f32 %v1446_v34, 1e-24 }
 0xc3e   :  { %2209 = vrsqrt.f32 %v1447_v36 }
 0xc4b   :  { %v2210_v37 = vpop.eup %2209 }
 0xc4c   :  { %v1449_v38 = vmul.f32 %v2210_v37, %v1442_v27 }
 0xc4e   :  { %1450 = vst.msk [vmem:[#allocation2] sm:$0xff] %vm185_vm2, %v1449_v38  ;;  %2159 = vmatmul.mubr.msk.f32.vlgmr.msra.gmra.mxu1 %vm185_vm2, %v1449_v38 }
 0xc4f   :  { %2174 = vmatprep.mubr.msk.f32.mxu1 %vm2234_vm1, %v2233_v2 }
 0xc55   :  { %v1542_v39 = vld [vmem:[#allocation2] sm:$0xff] }
 0xc56   :  { %2170 = vmatmul.mubr.msk.f32.vlgmr.msra.gmra.mxu0 %vm185_vm2, %v1542_v39 }
 0xc57   :  { %2178 = vmatpush3.msra.mxu0 %v2284_v15  ;;  %2185 = vmatprep.mubr.msk.f32.mxu0 %vm2234_vm1, %v2233_v2 }
 0xc58   :  { %2179 = vmatprep.subr.mxu0 %v2233_v2 }
 0xc59   :  { %2180 = vmatpush3.msra.mxu0 %v2291_v17 }
 0xc5a   :  { %2181 = vmatprep.subr.mxu0 %v2233_v2 }
 0xc5b   :  { %2182 = vmatpush3.msra.mxu0 %v2300_v18  ;;  %v1916_v18 = vld [vmem:[%s2594_s2 + $0xf8] ss:$0 sm:$0xff] }
 0xc5c   :  { %2183 = vmatprep.subr.mxu0 %v2233_v2 }
 0xc5d   :  { %2184 = vmatpush3.msra.mxu0 %v2307_v19 }
 0xd0e   :  { %v1530_v41 = vpop.f32.mrf.mxu1 }
 0xd0f   :  { %v1531_v42 = vadd.f32 %v2354_v35, %v1530_v41 }
 0xd10   :  { %v2160_v43 = vpop.f32.mrf.mxu1 }
 0xd11   :  { %v1534_v15 = vmax.f32 %v1531_v42, 0.0 }
 0xd13   :  { %v1535_v45 = vadd.f32 %v1534_v15, %v1451_v44 }
 0xd15   :  { %1536 = vst.msk [vmem:[#allocation3] sm:$0xff] %vm185_vm2, %v1535_v45 }
 0xd16   :  { %v1612_v46 = vpop.f32.mrf.mxu0 }
 0xd17   :  { %2173 = vmatpush3.msra.mxu1 %v1612_v46 }
 0xd18   :  { %v2171_v17 = vpop.f32.mrf.mxu0  ;;  %2175 = vmatmul.mubr.msk.f32.vlgmr.msra.gmra.mxu1 %vm27_vm0, %v2358_v40  ;;  %2188 = vmatprep.subr.mxu1 %v2233_v2  ;;  %v1783_v40 = vld [vmem:[%s2594_s2 + $0x130] sm:$0x1] }
 0xd19   :  { %2190 = vmatprep.mubr.msk.f32.mxu1 %vm2234_vm1, %v2233_v2  ;;  %v1785_v51 = vmul.f32 7.0, %v1783_v40 }
 0xd1b   :  { %1788 = vperm.xlu0 %2198, %v1785_v51  }
 0xd1c   :  { %v1696_v55 = vld [vmem:[#allocation3] sm:$0xff] }
 0xd96   :  { %v1789_v59 = vpop.permute.xlu0 %1788 }
 0xdd8   :  { %v1690_v19 = vpop.f32.mrf.mxu1 }
 0xdd9   :  { %v1691_v47 = vadd.f32 %v1916_v18, %v1690_v19 }
 0xdda   :  { %v2176_v48 = vpop.f32.mrf.mxu1 }
 0xddb   :  { %v1694_v49 = vmax.f32 %v1691_v47, 0.0 }
 0xddd   :  { %1695 = vst.msk [vmem:[#allocation2] sm:$0xff] %vm185_vm2, %v1694_v49  ;;  %2186 = vmatmul.mubr.msk.f32.vlgmr.msra.gmra.mxu0 %vm185_vm2, %v1694_v49 }
 0xe9d   :  { %v1775_v2 = vpop.f32.mrf.mxu0 }
 0xe9e   :  { %v1776_v52 = vadd.f32 %v2354_v35, %v1775_v2 }
 0xe9f   :  { %v2187_v53 = vpop.f32.mrf.mxu0 }
 0xea0   :  { %v1779_v54 = vmax.f32 %v1776_v52, 0.0 }
 0xea2   :  { %v1780_v56 = vadd.f32 %v1779_v54, %v1696_v55 }
 0xea4   :  { %1781 = vst.msk [vmem:[#allocation3] sm:$0xff] %vm185_vm2, %v1780_v56 }
 0xeab   :  { %v1784_v57 = vld [vmem:[#allocation3] sm:$0xff] }
 0xeac   :  { %2189 = vmatpush3.xpose.msk.msra.mxu1 %vm185_vm2, %v1784_v57 }
 0xeaf   :  { %2191 = vmatmul.mubr.msk.f32.vlgmr.msra.gmra.mxu1 %vm185_vm2, %v1782_v58 }
 0xf6f   :  { %v1863_v60 = vpop.f32.mrf.mxu1 }
 0xf70   :  { %v1864_v35 = vadd.f32 %v1863_v60, %v1789_v59 }
 0xf71   :  { %v2192_v61 = vpop.f32.mrf.mxu1 }
 0xf72   :  { %1868 = vst.msk [vmem:[#allocation5] sm:$0x1] %vm1867_vm5, %v1864_v35 }
 0xf73   :  { %2222 = shalt.err (!%p2219_p4)
}
 0xf74   :  { %1878 = dma.vmem_to_hbm [thread:$0]  %s1876_s8, 16, %s2595_s3, [#allocation6]  }
 0xf75   :  { %2231 = dma.done.wait [#allocation6], 16  }
 0xf76   :  { %2232 = vsyncadd [#allocation6], 4294967280 }
 0xf77   :  { %1882 = vsyncpa [#allocation6], 1 }

</bundles_post_ra>
